<compile_context>
chip_gen: v5e
topology: v5e:2x2
jax: 0.10.0
libtpu: 0.0.40
codegen_flags: <defaults>
</compile_context>

<pallas_src>
import functools
import math

import jax
import jax.numpy as jnp
from jax.experimental import pallas as pl
from jax.experimental.pallas import tpu as pltpu


def conv_bn_kernel(w_ref, p_ref, o_ref):
    # w_ref: (Cout, KKC+1) bf16 — BN scale folded in; last column = fused shift
    # p_ref: (B, KKC+1, Mp) bf16 — im2col patches (+ constant-1 row), lane-padded
    # o_ref: (B, Cout, Mp)  f32
    w = w_ref[...]
    for b in range(p_ref.shape[0]):   # static chunk-batch loop (B is small)
        o_ref[b] = jnp.dot(w, p_ref[b], preferred_element_type=jnp.float32)


def fold_conv_bn_params(w, b, gamma, beta, running_mean, running_var, eps=1e-5):
    """Fold eval-mode BN into the conv weight and append the fused
    conv-bias + BN shift as an extra contraction column.  Computed once;
    hoisted out of the per-call jitted forward."""
    Cout, Cin, K, _ = w.shape
    KKC = K * K * Cin
    bn_scale = gamma / jnp.sqrt(running_var + eps)                  # (Cout,)
    # (Cout,Cin,K,K) -> (K,K,Cin,Cout) -> (KKC, Cout); row order (kh, kw, cin)
    w_mat = jnp.transpose(w, (2, 3, 1, 0)).reshape(KKC, Cout)
    w_fold_t = (w_mat * bn_scale[None, :]).T                        # (Cout, KKC)
    shift = (b - running_mean) * bn_scale + beta                    # (Cout,)
    w_aug = jnp.concatenate([w_fold_t, shift[:, None]], axis=1)     # (Cout, KKC+1)
    return w_aug.astype(jnp.bfloat16)


@functools.partial(jax.jit, static_argnames=("kernel_size",))
def conv_bn_forward(x, w_aug, kernel_size=3):
    """x: (N, Cin, H, W) f32, w_aug: (Cout, K*K*Cin + 1) bf16 (pre-folded)."""
    N, Cin, H, W = x.shape
    K = kernel_size
    Cout, KKC1 = w_aug.shape
    Hout, Wout = H - K + 1, W - K + 1
    M = Hout * Wout
    Mp = max(128, ((M + 127) // 128) * 128)   # lane-dense output / unmasked vst

    # At most 2 grid steps: keeps per-step overhead negligible and feeds both
    # v7x TensorCores; on 1-TC chips (v5e/v6e) the annotation is a no-op.
    num_chunks = 2 if N >= 2 else 1
    B = pl.cdiv(N, num_chunks)
    Npad = num_chunks * B

    # ---- im2col glue (plain JAX, fused by jit), transposed orientation ----
    # Row ordering (kh, kw, cin) matches the weight fold above; a constant-1
    # row is appended so the shift is absorbed by the contraction.
    taps = []
    for kh in range(K):
        for kw in range(K):
            taps.append(x[:, :, kh:kh + Hout, kw:kw + Wout].reshape(N, Cin, M))
    taps.append(jnp.ones((N, 1, M), x.dtype))
    patches = jnp.concatenate(taps, axis=1)                         # (N, KKC+1, M)
    patches = jnp.pad(patches, ((0, Npad - N), (0, 0), (0, Mp - M)))
    patches = patches.astype(jnp.bfloat16)

    out = pl.pallas_call(
        conv_bn_kernel,
        out_shape=jax.ShapeDtypeStruct((Npad, Cout, Mp), jnp.float32),
        grid_spec=pltpu.PrefetchScalarGridSpec(
            num_scalar_prefetch=0,
            grid=(num_chunks,),
            in_specs=[
                pl.BlockSpec((Cout, KKC1), lambda c: (0, 0)),
                pl.BlockSpec((B, KKC1, Mp), lambda c: (c, 0, 0)),
            ],
            out_specs=pl.BlockSpec((B, Cout, Mp), lambda c: (c, 0, 0)),
        ),
        compiler_params=pltpu.CompilerParams(
            dimension_semantics=("parallel",)),
    )(w_aug, patches)

    # Drop batch / lane padding; (N, Cout, M) is already channel-major -> NCHW.
    return out[:N, :, :M].reshape(N, Cout, Hout, Wout)


if __name__ == "__main__":
    N, Cin, H, W = 2, 3, 16, 16
    Cout, K = 128, 3

    key = jax.random.PRNGKey(0)
    kw_, kb_, kx_ = jax.random.split(key, 3)

    # PyTorch-default-style deterministic init
    fan_in = Cin * K * K
    bound = 1.0 / math.sqrt(fan_in)
    w = jax.random.uniform(kw_, (Cout, Cin, K, K), jnp.float32, -bound, bound)
    b = jax.random.uniform(kb_, (Cout,), jnp.float32, -bound, bound)
    gamma = jnp.ones((Cout,), jnp.float32)
    beta = jnp.zeros((Cout,), jnp.float32)
    running_mean = jnp.zeros((Cout,), jnp.float32)
    running_var = jnp.ones((Cout,), jnp.float32)

    x = jax.random.normal(kx_, (N, Cin, H, W), jnp.float32)

    eps = 1e-5
    w_aug = fold_conv_bn_params(w, b, gamma, beta, running_mean, running_var, eps)
    y = conv_bn_forward(x, w_aug, kernel_size=K)
    y = jax.block_until_ready(y)

    # lightweight reference check with XLA's conv (f32); kernel uses bf16 MXU
    # inputs (and a bf16 fused shift) so the tolerance is slightly loosened.
    ref = jax.lax.conv_general_dilated(
        x, w, window_strides=(1, 1), padding="VALID",
        dimension_numbers=("NCHW", "OIHW", "NCHW"))
    ref = ref + b.reshape(1, Cout, 1, 1)
    ref = (ref - running_mean.reshape(1, Cout, 1, 1)) / jnp.sqrt(
        running_var.reshape(1, Cout, 1, 1) + eps)
    ref = ref * gamma.reshape(1, Cout, 1, 1) + beta.reshape(1, Cout, 1, 1)

    assert y.shape == (N, Cout, H - K + 1, W - K + 1), y.shape
    assert jnp.all(jnp.isfinite(y))
    assert jnp.allclose(y, ref, atol=3e-2, rtol=3e-2)
    print("KERNEL_OK")
</pallas_src>

<mosaic_0001>
module attributes {stable_mosaic.version = 11 : i64} {
  func.func @conv_bn_kernel(%arg0: i32, %arg1: memref<128x28xbf16, #tpu.memory_space<vmem>>, %arg2: memref<1x28x256xbf16, #tpu.memory_space<vmem>>, %arg3: memref<1x128x256xf32, #tpu.memory_space<vmem>>) attributes {dimension_semantics = [#tpu.dimension_semantics<parallel>], iteration_bounds = array<i64: 2>, scalar_prefetch = 0 : i64, scratch_operands = 0 : i64, tpu.core_type = #tpu.core_type<tc>, window_params = [{pipeline_mode = #tpu.pipeline_mode<synchronous>, transform_indices = @transform_0, window_bounds = array<i64: 128, 28>}, {transform_indices = @transform_1, window_bounds = array<i64: 1, 28, 256>}, {transform_indices = @transform_2, window_bounds = array<i64: 1, 128, 256>}]} {
    %c0 = arith.constant 0 : index
    %c0_0 = arith.constant 0 : index
    %0 = vector.load %arg1[%c0, %c0_0] : memref<128x28xbf16, #tpu.memory_space<vmem>>, vector<128x28xbf16>
    %c0_1 = arith.constant 0 : index
    %c0_2 = arith.constant 0 : index
    %c0_3 = arith.constant 0 : index
    %1 = vector.load %arg2[%c0_1, %c0_2, %c0_3] : memref<1x28x256xbf16, #tpu.memory_space<vmem>>, vector<1x28x256xbf16>
    %2 = vector.shape_cast %1 : vector<1x28x256xbf16> to vector<28x256xbf16>
    %cst = arith.constant dense<0.000000e+00> : vector<128x256xf32>
    %3 = tpu.matmul %0, %2, %cst {dimension_numbers = #tpu.dot_dimension_numbers<[1], [0], [0], [1], [0, 0, 1, 1], [], []>} : vector<128x28xbf16>, vector<28x256xbf16>, vector<128x256xf32> -> vector<128x256xf32>
    %c0_4 = arith.constant 0 : index
    %c0_5 = arith.constant 0 : index
    %c0_6 = arith.constant 0 : index
    %4 = vector.load %arg3[%c0_4, %c0_5, %c0_6] : memref<1x128x256xf32, #tpu.memory_space<vmem>>, vector<1x128x256xf32>
    %5 = vector.shape_cast %4 : vector<1x128x256xf32> to vector<128x256xf32>
    %6 = vector.shape_cast %3 : vector<128x256xf32> to vector<1x128x256xf32>
    tpu.vector_store %arg3[%c0_4, %c0_5, %c0_6], %6 {strides = array<i32>} : memref<1x128x256xf32, #tpu.memory_space<vmem>>, vector<1x128x256xf32>,
    return
  }
  func.func @transform_0(%arg0: i32) -> (i32, i32) {
    %c0_i32 = arith.constant 0 : i32
    %c0_i32_0 = arith.constant 0 : i32
    %c0_i32_1 = arith.constant 0 : i32
    return %c0_i32, %c0_i32_0 : i32, i32
  }
  func.func @transform_1(%arg0: i32) -> (i32, i32, i32) {
    %c0_i32 = arith.constant 0 : i32
    %c0_i32_0 = arith.constant 0 : i32
    %c0_i32_1 = arith.constant 0 : i32
    return %arg0, %c0_i32, %c0_i32_0 : i32, i32, i32
  }
  func.func @transform_2(%arg0: i32) -> (i32, i32, i32) {
    %c0_i32 = arith.constant 0 : i32
    %c0_i32_0 = arith.constant 0 : i32
    %c0_i32_1 = arith.constant 0 : i32
    return %arg0, %c0_i32, %c0_i32_0 : i32, i32, i32
  }
}

</mosaic_0001>

<bundles_post_ra>
// kernel: conv_bn_forward.1
= control target key start
LH: loop header
LB: loop body
LE: loop exit
PB: predicated region body
PF: predicated region fallthrough
CT: control target
= control target key end

     0   :  { %s564_s9 = smov 0   ;;  %s659_s0 = inlined_call_operand.vmem [shape: bf16[128,28], index: 0, kind: input, shape index: {}]   ;;  %s660_s1 = inlined_call_operand.vmem [shape: bf16[2,28,256], index: 1, kind: input, shape index: {}]   ;;  %s661_s2 = inlined_call_operand.vmem [shape: f32[2,128,256], index: 2, kind: output, shape index: {}]  }
   0x1 LB: > { %s440_s10 = sadd.s32 4294967295, %s547_s9   ;;  %p444_p0 = scmp.ge.s32.totalorder %s547_s9, 1  ;;  %s547_s9 = sphi %s564_s9, %s12_s9  }
   0x2   : > { %p112_p1 = scmp.lt.s32.totalorder %s547_s9, 3 }
   0x4   : > { %p113_p2 = pnand %p444_p0, %p112_p1 }
   0x5   : > { %p134_p3 = scmp.lt.s32.totalorder (!%p113_p2), %s440_s10, 1 }
   0x6   : > { %116 = sbr.rel (%p113_p2) target bundleno = 215 (0xd7), region = 28 }
   0xb   : > { %s663_s10 = smov (!%p134_p3, %s440_s10), 1  ;;  %vm248_vm0 = vcmask 1045504   ;;  %v517_v14 = vld [vmem:[%s659_s0] sm:$0xff]  ;;  %vm223_vm1 = vcmask 228352   ;;  %v518_v16 = vld [vmem:[%s659_s0 + $0x8] sm:$0xff]  ;;  %v519_v18 = vld [vmem:[%s659_s0 + $0x10] sm:$0xff] }
   0xc   : > { %s515_s11 = sshll.u32 %s663_s10, 5  ;;  %v521_v15 = vld [vmem:[%s659_s0 + $0x20] sm:$0xff]  ;;  %v522_v17 = vld [vmem:[%s659_s0 + $0x28] sm:$0xff]  ;;  %v523_v19 = vld [vmem:[%s659_s0 + $0x30] sm:$0xff]  ;;  %s516_s3 = sshll.u32 %s663_s10, 8 }
   0xd   : > { %s138_s14 = scalar_lea.vmem %s660_s1, %s515_s11  ;;  %v520_v20 = vld [vmem:[%s659_s0 + $0x18] sm:$0xff]  ;;  %s622_s6 = scalar_lea.vmem %s661_s2, %s516_s3 }
   0xe   : > { %v491_v0 = vld [vmem:[%s138_s14 + $0x10] sm:$0xf]  ;;  %v528_v1 = vld [vmem:[%s138_s14 + $0x14] sm:$0x30]  ;;  %v527_v2 = vld [vmem:[%s138_s14 + $0x14] sm:$0xf] }
   0xf   : > { %v492_v3 = vor.u32 %v528_v1, %v491_v0  ;;  %v493_v4 = vld [vmem:[%s138_s14 + $0x18] sm:$0x30]  ;;  %v483_v5 = vld [vmem:[%s138_s14] sm:$0xf]  ;;  %v526_v6 = vld [vmem:[%s138_s14 + $0x4] sm:$0xf0] }
  0x10   : > { %v496_v7 = vor.u32 %v527_v2, %v493_v4  ;;  %v525_v8 = vld [vmem:[%s138_s14 + $0x4] sm:$0xf]  ;;  %v485_v9 = vld [vmem:[%s138_s14 + $0x8] sm:$0xf0]  ;;  %v484_v12 = vor.u32 %v526_v6, %v483_v5  ;;  %v524_v21 = vld [vmem:[%s659_s0 + $0x38] sm:$0xff] }
  0x11   : > { %v250_v10 = vsel %vm248_vm0, %v492_v3, 0  ;;  %v488_v13 = vor.u32 %v525_v8, %v485_v9 }
  0x12   : > { %261 = vmatpush.bf16.msra.mxu0 %v250_v10  ;;  %529 = vmatpush.bf16.msra.mxu2 %v250_v10  ;;  %v253_v11 = vsel %vm248_vm0, %v496_v7, 0 }
  0x13   : > { %310 = vmatpush.bf16.msra.mxu1 %v253_v11  ;;  %531 = vmatpush.bf16.msra.mxu3 %v253_v11 }
  0x16   : > { %262 = vmatpush.bf16.msra.mxu0 %v484_v12  ;;  %530 = vmatpush.bf16.msra.mxu2 %v484_v12 }
  0x17   : > { %311 = vmatpush.bf16.msra.mxu1 %v488_v13  ;;  %532 = vmatpush.bf16.msra.mxu3 %v488_v13 }
  0x19   : > { %497 = vmatmul.msk.bf16.vlgmr.msra.gmra.mxu0 %vm223_vm1, %v517_v14  ;;  %501 = vmatmul.msk.bf16.vlgmr.msra.gmra.mxu2 %vm223_vm1, %v521_v15 }
  0x1a   : > { %505 = vmatmul.msk.bf16.vlgmr.msra.gmra.mxu1 %vm223_vm1, %v517_v14  ;;  %509 = vmatmul.msk.bf16.vlgmr.msra.gmra.mxu3 %vm223_vm1, %v521_v15 }
  0x29   : > { %498 = vmatmul.msk.bf16.gmra.mxu0 %vm223_vm1, %v518_v16  ;;  %502 = vmatmul.msk.bf16.gmra.mxu2 %vm223_vm1, %v522_v17 }
  0x2a   : > { %506 = vmatmul.msk.bf16.gmra.mxu1 %vm223_vm1, %v518_v16  ;;  %510 = vmatmul.msk.bf16.gmra.mxu3 %vm223_vm1, %v522_v17 }
  0x39   : > { %499 = vmatmul.msk.bf16.gmra.mxu0 %vm223_vm1, %v519_v18  ;;  %503 = vmatmul.msk.bf16.gmra.mxu2 %vm223_vm1, %v523_v19 }
  0x3a   : > { %507 = vmatmul.msk.bf16.gmra.mxu1 %vm223_vm1, %v519_v18  ;;  %511 = vmatmul.msk.bf16.gmra.mxu3 %vm223_vm1, %v523_v19 }
  0x49   : > { %500 = vmatmul.msk.bf16.gmra.mxu0 %vm223_vm1, %v520_v20  ;;  %504 = vmatmul.msk.bf16.gmra.mxu2 %vm223_vm1, %v524_v21 }
  0x4a   : > { %508 = vmatmul.msk.bf16.gmra.mxu1 %vm223_vm1, %v520_v20  ;;  %512 = vmatmul.msk.bf16.gmra.mxu3 %vm223_vm1, %v524_v21 }
  0x96   : > { %v264_v22 = vpop.f32.mrf.mxu0 }
  0x97   : > { %353 = vst [vmem:[%s622_s6] sm:$0xff] %v264_v22  ;;  %v313_v23 = vpop.f32.mrf.mxu1 }
  0x98   : > { %354 = vst [vmem:[%s622_s6 + $0x8] sm:$0xff] %v313_v23 }
  0x9c   : > { %v284_v24 = vpop.f32.mrf.mxu2 }
  0x9d   : > { %369 = vst [vmem:[%s622_s6 + $0x80] sm:$0xff] %v284_v24  ;;  %v333_v25 = vpop.f32.mrf.mxu3 }
  0x9e   : > { %370 = vst [vmem:[%s622_s6 + $0x88] sm:$0xff] %v333_v25  ;;  %v266_v26 = vpop.f32.mrf.mxu0 }
  0x9f   : > { %355 = vst [vmem:[%s622_s6 + $0x10] sm:$0xff] %v266_v26  ;;  %v315_v27 = vpop.f32.mrf.mxu1 }
  0xa0   : > { %356 = vst [vmem:[%s622_s6 + $0x18] sm:$0xff] %v315_v27 }
  0xa4   : > { %v286_v28 = vpop.f32.mrf.mxu2 }
  0xa5   : > { %371 = vst [vmem:[%s622_s6 + $0x90] sm:$0xff] %v286_v28  ;;  %v335_v29 = vpop.f32.mrf.mxu3 }
  0xa6   : > { %372 = vst [vmem:[%s622_s6 + $0x98] sm:$0xff] %v335_v29  ;;  %v269_v30 = vpop.f32.mrf.mxu0 }
  0xa7   : > { %357 = vst [vmem:[%s622_s6 + $0x20] sm:$0xff] %v269_v30  ;;  %v318_v31 = vpop.f32.mrf.mxu1 }
  0xa8   : > { %358 = vst [vmem:[%s622_s6 + $0x28] sm:$0xff] %v318_v31 }
  0xac   : > { %v289_v32 = vpop.f32.mrf.mxu2 }
  0xad   : > { %373 = vst [vmem:[%s622_s6 + $0xa0] sm:$0xff] %v289_v32  ;;  %v338_v33 = vpop.f32.mrf.mxu3 }
  0xae   : > { %374 = vst [vmem:[%s622_s6 + $0xa8] sm:$0xff] %v338_v33  ;;  %v271_v34 = vpop.f32.mrf.mxu0 }
  0xaf   : > { %359 = vst [vmem:[%s622_s6 + $0x30] sm:$0xff] %v271_v34  ;;  %v320_v35 = vpop.f32.mrf.mxu1 }
  0xb0   : > { %360 = vst [vmem:[%s622_s6 + $0x38] sm:$0xff] %v320_v35 }
  0xb4   : > { %v291_v36 = vpop.f32.mrf.mxu2 }
  0xb5   : > { %375 = vst [vmem:[%s622_s6 + $0xb0] sm:$0xff] %v291_v36  ;;  %v340_v37 = vpop.f32.mrf.mxu3 }
  0xb6   : > { %376 = vst [vmem:[%s622_s6 + $0xb8] sm:$0xff] %v340_v37  ;;  %v274_v38 = vpop.f32.mrf.mxu0 }
  0xb7   : > { %361 = vst [vmem:[%s622_s6 + $0x40] sm:$0xff] %v274_v38  ;;  %v323_v39 = vpop.f32.mrf.mxu1 }
  0xb8   : > { %362 = vst [vmem:[%s622_s6 + $0x48] sm:$0xff] %v323_v39 }
  0xbc   : > { %v294_v40 = vpop.f32.mrf.mxu2 }
  0xbd   : > { %377 = vst [vmem:[%s622_s6 + $0xc0] sm:$0xff] %v294_v40  ;;  %v343_v41 = vpop.f32.mrf.mxu3 }
  0xbe   : > { %378 = vst [vmem:[%s622_s6 + $0xc8] sm:$0xff] %v343_v41  ;;  %v276_v42 = vpop.f32.mrf.mxu0 }
  0xbf   : > { %363 = vst [vmem:[%s622_s6 + $0x50] sm:$0xff] %v276_v42  ;;  %v325_v43 = vpop.f32.mrf.mxu1 }
  0xc0   : > { %364 = vst [vmem:[%s622_s6 + $0x58] sm:$0xff] %v325_v43 }
  0xc4   : > { %v296_v44 = vpop.f32.mrf.mxu2 }
  0xc5   : > { %379 = vst [vmem:[%s622_s6 + $0xd0] sm:$0xff] %v296_v44  ;;  %v345_v45 = vpop.f32.mrf.mxu3 }
  0xc6   : > { %380 = vst [vmem:[%s622_s6 + $0xd8] sm:$0xff] %v345_v45  ;;  %v279_v46 = vpop.f32.mrf.mxu0 }
  0xc7   : > { %365 = vst [vmem:[%s622_s6 + $0x60] sm:$0xff] %v279_v46  ;;  %v328_v47 = vpop.f32.mrf.mxu1 }
  0xc8   : > { %366 = vst [vmem:[%s622_s6 + $0x68] sm:$0xff] %v328_v47 }
  0xcc   : > { %v299_v48 = vpop.f32.mrf.mxu2 }
  0xcd   : > { %381 = vst [vmem:[%s622_s6 + $0xe0] sm:$0xff] %v299_v48  ;;  %v348_v49 = vpop.f32.mrf.mxu3 }
  0xce   : > { %382 = vst [vmem:[%s622_s6 + $0xe8] sm:$0xff] %v348_v49  ;;  %v281_v50 = vpop.f32.mrf.mxu0 }
  0xcf   : > { %367 = vst [vmem:[%s622_s6 + $0x70] sm:$0xff] %v281_v50  ;;  %v330_v51 = vpop.f32.mrf.mxu1 }
  0xd0   : > { %368 = vst [vmem:[%s622_s6 + $0x78] sm:$0xff] %v330_v51 }
  0xd4   : > { %v301_v52 = vpop.f32.mrf.mxu2 }
  0xd5   : > { %383 = vst [vmem:[%s622_s6 + $0xf0] sm:$0xff] %v301_v52  ;;  %v350_v53 = vpop.f32.mrf.mxu3 }
  0xd6   : > { %384 = vst [vmem:[%s622_s6 + $0xf8] sm:$0xff] %v350_v53 }
  0xd7 PF: > { %s12_s9 = sadd.s32 1, %s547_s9  }
  0xd8   : > { %p9_p4 = scmp.ge.s32.totalorder %s12_s9, 4  }
  0xda   :  { %11 = sbr.rel (!%p9_p4) target bundleno = 1 (0x1), region = 58 }

</bundles_post_ra>
